<compile_context>
chip_gen: v5e
topology: v5e:2x2
jax: 0.10.0
libtpu: 0.0.40
codegen_flags: <defaults>
</compile_context>

<pallas_src>
import jax
import jax.numpy as jnp
from jax.experimental import pallas as pl
from jax.experimental.pallas import tpu as pltpu


# ----------------------------- Pallas kernel ---------------------------------

def fused_rgcn_kernel(x_ref,      # VMEM [N, (R+1)*D] bf16  [A_0E | ... | A_{R-1}E | E]
                      wbig_ref,   # VMEM [(R+1)*D, D] bf16  [W_0 ; ... ; W_{R-1} ; W_self]
                      bias_ref,   # VMEM [1, D]       f32
                      s_ref,      # VMEM [B, N]       f32   selection / mean-weight matrix
                      w1_ref,     # VMEM [D, D]       f32
                      b1_ref,     # VMEM [1, D]       f32
                      w2t_ref,    # VMEM [1, D]       f32
                      b2_ref,     # VMEM [1, 1]       f32
                      out_ref):   # VMEM [B, 128]     f32   lane-dense output slab
    # ---- encoder: H = relu(X @ W_big + b)  -- one K=(R+1)*D MXU contraction --
    h = jnp.dot(x_ref[...], wbig_ref[...],
                preferred_element_type=jnp.float32)                      # [N, D] f32
    h = jnp.maximum(h + bias_ref[...], 0.0)

    # ---- support (head, tail) gather + mean over (K, 2) as one matmul --------
    mean = jnp.dot(s_ref[...], h, preferred_element_type=jnp.float32)    # [B, D] f32

    # ---- MLP head: Linear -> ReLU -> Linear -> sigmoid -----------------------
    h1 = jnp.dot(mean, w1_ref[...],
                 preferred_element_type=jnp.float32) + b1_ref[...]       # [B, D] f32
    h1 = jnp.maximum(h1, 0.0)
    # final Linear(D -> 1) as a lane reduction (avoids a 1-lane MXU matmul)
    o = jnp.sum(h1 * w2t_ref[...], axis=-1, keepdims=True) + b2_ref[...]  # [B, 1]
    # numerically stable sigmoid on the EUP: sigmoid(x) = 0.5 * (tanh(x/2) + 1)
    sig = 0.5 * (jnp.tanh(0.5 * o) + 1.0)
    # lane-dense store; caller slices [:, :1]
    out_ref[...] = jnp.broadcast_to(sig, out_ref.shape)


# ------------------------------ JAX wrapper -----------------------------------

_VMEM = pl.BlockSpec(memory_space=pltpu.MemorySpace.VMEM)


def rgcn_module_forward(support_set, params, adj):
    """support_set: int32 [B, K, 3] triplets (head, rel, tail) -> sigmoid scores [B, 1]."""
    n, d = params["emb"].shape
    r = params["w_rel"].shape[0]
    b, k, _ = support_set.shape
    g = 2 * k                                 # rows gathered (head, tail) per batch
    out_lanes = 128                           # lane-dense output slab

    emb = params["emb"]

    # --- one-time parameter/graph-side prep (XLA glue, done once per call) ----
    # AE_cat[:, r*D:(r+1)*D] = A_r @ E    -> [N, R*D]
    ae = jnp.einsum("rij,jd->rid", adj, emb)                         # [R, N, D]
    ae_cat = jnp.transpose(ae, (1, 0, 2)).reshape(n, r * d)          # [N, R*D]
    x = jnp.concatenate([ae_cat, emb], axis=1)                       # [N, (R+1)*D]
    # W_big = [W_0 ; ... ; W_{R-1} ; W_self]  -> [(R+1)*D, D]
    w_big = jnp.concatenate([params["w_rel"].reshape(r * d, d),
                             params["w_self"]], axis=0)

    # Selection matrix S[b, node] = (#occurrences of node as head/tail) / (2K),
    # so  S @ H == mean over (K, 2) of H[support (head, tail) indices].
    idx = support_set[..., jnp.array([0, 2])].reshape(b, g).astype(jnp.int32)
    s = jnp.zeros((b, n), jnp.float32).at[
        jnp.arange(b)[:, None], idx].add(1.0 / g)

    # bf16 only at the big MXU boundary; f32 accumulate + f32 epilogue inside.
    x_b = x.astype(jnp.bfloat16)
    wbig_b = w_big.astype(jnp.bfloat16)
    w2t = params["w2"].T                                             # [1, D] f32 (VPU)

    flops = (2 * n * ((r + 1) * d) * d     # X @ W_big
             + 2 * b * n * d               # S @ H
             + 2 * b * d * d               # MLP layer 1
             + 2 * b * d)                  # MLP layer 2 (lane reduction)
    operands = (x_b, wbig_b, params["rgcn_bias"], s,
                params["w1"], params["b1"], w2t, params["b2"])
    bytes_accessed = int(sum(int(a.size) * a.dtype.itemsize for a in operands)
                         + b * out_lanes * 4)

    out_slab = pl.pallas_call(
        fused_rgcn_kernel,
        out_shape=jax.ShapeDtypeStruct((b, out_lanes), jnp.float32),
        in_specs=[_VMEM] * len(operands),
        out_specs=_VMEM,
        cost_estimate=pl.CostEstimate(flops=int(flops), transcendentals=b,
                                      bytes_accessed=bytes_accessed),
    )(*operands)
    return out_slab[:, :1]                                           # [B, 1]


# --------------------------- pure-JAX f32 reference ----------------------------

def rgcn_module_reference(support_set, params, adj):
    emb = params["emb"]
    msg = jnp.einsum("rij,jd,rde->ie", adj, emb, params["w_rel"])
    h = jax.nn.relu(emb @ params["w_self"] + msg + params["rgcn_bias"])
    idx = support_set[..., jnp.array([0, 2])]                        # [B, K, 2]
    mean = jnp.mean(h[idx], axis=(1, 2))                             # [B, D]
    h1 = jax.nn.relu(mean @ params["w1"] + params["b1"])
    return jax.nn.sigmoid(h1 @ params["w2"] + params["b2"])          # [B, 1]


# --------------------------------- main ----------------------------------------

if __name__ == "__main__":
    # Small deterministic configuration.
    N_NODES = 16        # nodes in the background graph
    N_REL = 4           # relation types
    D = 32              # rgcn_embed_dim
    B = 2               # batch of support sets
    K = 3               # triplets per support set (few-shot K)
    N_EDGES = 40

    key = jax.random.PRNGKey(0)
    keys = jax.random.split(key, 16)                  # fresh split per use, no reuse

    params = {
        "emb":       0.1 * jax.random.normal(keys[0], (N_NODES, D), jnp.float32),
        "w_self":    0.1 * jax.random.normal(keys[1], (D, D), jnp.float32),
        "w_rel":     0.1 * jax.random.normal(keys[2], (N_REL, D, D), jnp.float32),
        "rgcn_bias": 0.1 * jax.random.normal(keys[3], (1, D), jnp.float32),
        "w1":        0.1 * jax.random.normal(keys[4], (D, D), jnp.float32),
        "b1":        0.1 * jax.random.normal(keys[5], (1, D), jnp.float32),
        "w2":        0.1 * jax.random.normal(keys[6], (D, 1), jnp.float32),
        "b2":        0.1 * jax.random.normal(keys[7], (1, 1), jnp.float32),
    }

    # Synthetic background graph -> dense per-relation adjacency.
    # Row i of A_r aggregates INCOMING edges (j -> i), normalized by in-degree
    # (Schlichtkrull R-GCN convention).
    e_head = jax.random.randint(keys[8], (N_EDGES,), 0, N_NODES)
    e_rel = jax.random.randint(keys[9], (N_EDGES,), 0, N_REL)
    e_tail = jax.random.randint(keys[10], (N_EDGES,), 0, N_NODES)
    adj = jnp.zeros((N_REL, N_NODES, N_NODES), jnp.float32)
    adj = adj.at[e_rel, e_tail, e_head].add(1.0)      # A_r[dst, src]
    deg = jnp.maximum(jnp.sum(adj, axis=-1, keepdims=True), 1.0)
    adj = adj / deg                                   # 1/c_{i,r} normalization

    # Support set: [B, K, 3] triplets (head, relation, tail).
    s_head = jax.random.randint(keys[11], (B, K, 1), 0, N_NODES)
    s_rel = jax.random.randint(keys[12], (B, K, 1), 0, N_REL)
    s_tail = jax.random.randint(keys[13], (B, K, 1), 0, N_NODES)
    support_set = jnp.concatenate([s_head, s_rel, s_tail], axis=-1).astype(jnp.int32)

    out = rgcn_module_forward(support_set, params, adj)
    out = jax.block_until_ready(out)
    ref = rgcn_module_reference(support_set, params, adj)

    assert out.shape == (B, 1) and out.dtype == jnp.float32
    assert bool(jnp.all(jnp.isfinite(out)))
    assert bool(jnp.all((out >= 0.0) & (out <= 1.0)))
    assert bool(jnp.allclose(out, ref, rtol=5e-3, atol=5e-3)), (out, ref)
    print("KERNEL_OK")
</pallas_src>

<mosaic_0001>
module attributes {stable_mosaic.version = 11 : i64} {
  func.func @fused_rgcn_kernel(%arg0: memref<16x160xbf16, #tpu.memory_space<vmem>>, %arg1: memref<160x32xbf16, #tpu.memory_space<vmem>>, %arg2: memref<1x32xf32, #tpu.memory_space<vmem>>, %arg3: memref<2x16xf32, #tpu.memory_space<vmem>>, %arg4: memref<32x32xf32, #tpu.memory_space<vmem>>, %arg5: memref<1x32xf32, #tpu.memory_space<vmem>>, %arg6: memref<1x32xf32, #tpu.memory_space<vmem>>, %arg7: memref<1x1xf32, #tpu.memory_space<vmem>>, %arg8: memref<2x128xf32, #tpu.memory_space<vmem>>) attributes {dimension_semantics = [], scalar_prefetch = 0 : i64, scratch_operands = 0 : i64, tpu.core_type = #tpu.core_type<tc>} {
    %c0 = arith.constant 0 : index
    %c0_0 = arith.constant 0 : index
    %0 = vector.load %arg0[%c0, %c0_0] : memref<16x160xbf16, #tpu.memory_space<vmem>>, vector<16x160xbf16>
    %c0_1 = arith.constant 0 : index
    %c0_2 = arith.constant 0 : index
    %1 = vector.load %arg1[%c0_1, %c0_2] : memref<160x32xbf16, #tpu.memory_space<vmem>>, vector<160x32xbf16>
    %cst = arith.constant dense<0.000000e+00> : vector<16x32xf32>
    %2 = tpu.matmul %0, %1, %cst {dimension_numbers = #tpu.dot_dimension_numbers<[1], [0], [0], [1], [0, 0, 1, 1], [], []>} : vector<16x160xbf16>, vector<160x32xbf16>, vector<16x32xf32> -> vector<16x32xf32>
    %c0_3 = arith.constant 0 : index
    %c0_4 = arith.constant 0 : index
    %3 = vector.load %arg2[%c0_3, %c0_4] : memref<1x32xf32, #tpu.memory_space<vmem>>, vector<1x32xf32>
    %4 = vector.broadcast %3 : vector<1x32xf32> to vector<16x32xf32>
    %5 = arith.addf %2, %4 : vector<16x32xf32>
    %cst_5 = arith.constant 0.000000e+00 : f32
    %6 = vector.broadcast %cst_5 : f32 to vector<16x32xf32>
    %7 = arith.maximumf %5, %6 : vector<16x32xf32>
    %c0_6 = arith.constant 0 : index
    %c0_7 = arith.constant 0 : index
    %8 = vector.load %arg3[%c0_6, %c0_7] : memref<2x16xf32, #tpu.memory_space<vmem>>, vector<2x16xf32>
    %cst_8 = arith.constant dense<0.000000e+00> : vector<2x32xf32>
    %9 = tpu.matmul %8, %7, %cst_8 {dimension_numbers = #tpu.dot_dimension_numbers<[1], [0], [0], [1], [0, 0, 1, 1], [], []>} : vector<2x16xf32>, vector<16x32xf32>, vector<2x32xf32> -> vector<2x32xf32>
    %c0_9 = arith.constant 0 : index
    %c0_10 = arith.constant 0 : index
    %10 = vector.load %arg4[%c0_9, %c0_10] : memref<32x32xf32, #tpu.memory_space<vmem>>, vector<32x32xf32>
    %cst_11 = arith.constant dense<0.000000e+00> : vector<2x32xf32>
    %11 = tpu.matmul %9, %10, %cst_11 {dimension_numbers = #tpu.dot_dimension_numbers<[1], [0], [0], [1], [0, 0, 1, 1], [], []>} : vector<2x32xf32>, vector<32x32xf32>, vector<2x32xf32> -> vector<2x32xf32>
    %c0_12 = arith.constant 0 : index
    %c0_13 = arith.constant 0 : index
    %12 = vector.load %arg5[%c0_12, %c0_13] : memref<1x32xf32, #tpu.memory_space<vmem>>, vector<1x32xf32>
    %13 = vector.broadcast %12 : vector<1x32xf32> to vector<2x32xf32>
    %14 = arith.addf %11, %13 : vector<2x32xf32>
    %cst_14 = arith.constant 0.000000e+00 : f32
    %15 = vector.broadcast %cst_14 : f32 to vector<2x32xf32>
    %16 = arith.maximumf %14, %15 : vector<2x32xf32>
    %c0_15 = arith.constant 0 : index
    %c0_16 = arith.constant 0 : index
    %17 = vector.load %arg6[%c0_15, %c0_16] : memref<1x32xf32, #tpu.memory_space<vmem>>, vector<1x32xf32>
    %18 = vector.broadcast %17 : vector<1x32xf32> to vector<2x32xf32>
    %19 = arith.mulf %16, %18 : vector<2x32xf32>
    %cst_17 = arith.constant dense<0.000000e+00> : vector<2xf32>
    %20 = vector.multi_reduction <add>, %19, %cst_17 [1] : vector<2x32xf32> to vector<2xf32>
    %21 = vector.shape_cast %20 : vector<2xf32> to vector<2x1xf32>
    %c0_18 = arith.constant 0 : index
    %c0_19 = arith.constant 0 : index
    %22 = vector.load %arg7[%c0_18, %c0_19] : memref<1x1xf32, #tpu.memory_space<vmem>>, vector<1x1xf32>
    %23 = vector.broadcast %22 : vector<1x1xf32> to vector<2x1xf32>
    %24 = arith.addf %21, %23 : vector<2x1xf32>
    %cst_20 = arith.constant 5.000000e-01 : f32
    %25 = vector.broadcast %cst_20 : f32 to vector<2x1xf32>
    %26 = arith.mulf %25, %24 : vector<2x1xf32>
    %27 = math.tanh %26 : vector<2x1xf32>
    %cst_21 = arith.constant 1.000000e+00 : f32
    %28 = vector.broadcast %cst_21 : f32 to vector<2x1xf32>
    %29 = arith.addf %27, %28 : vector<2x1xf32>
    %cst_22 = arith.constant 5.000000e-01 : f32
    %30 = vector.broadcast %cst_22 : f32 to vector<2x1xf32>
    %31 = arith.mulf %30, %29 : vector<2x1xf32>
    %32 = vector.shape_cast %31 : vector<2x1xf32> to vector<2x1xf32>
    %33 = vector.broadcast %32 : vector<2x1xf32> to vector<2x128xf32>
    %c0_23 = arith.constant 0 : index
    %c0_24 = arith.constant 0 : index
    %34 = vector.load %arg8[%c0_23, %c0_24] : memref<2x128xf32, #tpu.memory_space<vmem>>, vector<2x128xf32>
    tpu.vector_store %arg8[%c0_23, %c0_24], %33 {strides = array<i32>} : memref<2x128xf32, #tpu.memory_space<vmem>>, vector<2x128xf32>,
    return
  }
}

</mosaic_0001>

<bundles_post_ra>
// kernel: tpu_custom_call.1
= control target key start
LH: loop header
LB: loop body
LE: loop exit
PB: predicated region body
PF: predicated region fallthrough
CT: control target
= control target key end

     0   :  { %s478_s0 = inlined_call_operand.vmem [shape: bf16[16,160], index: 0, kind: input, shape index: {}]   ;;  %s479_s1 = inlined_call_operand.vmem [shape: bf16[160,32], index: 1, kind: input, shape index: {}]   ;;  %s480_s2 = inlined_call_operand.vmem [shape: f32[1,32], index: 2, kind: input, shape index: {}]   ;;  %s481_s3 = inlined_call_operand.vmem [shape: f32[2,16], index: 3, kind: input, shape index: {}]   ;;  %s482_s4 = inlined_call_operand.vmem [shape: f32[32,32], index: 4, kind: input, shape index: {}]   ;;  %s483_s5 = inlined_call_operand.vmem [shape: f32[1,32], index: 5, kind: input, shape index: {}]   ;;  %s484_s6 = inlined_call_operand.vmem [shape: f32[1,32], index: 6, kind: input, shape index: {}]   ;;  %s485_s7 = inlined_call_operand.<no memory space> [shape: f32[1,1], index: 7, kind: input, shape index: {}]   ;;  %s486_s8 = inlined_call_operand.hbm [shape: f32[2,128], index: 8, kind: output, shape index: {}]  }
   0x1   :  { %v13_v0 = vstv %s485_s7 }
   0x2   :  { %14 = vst [vmem:[#allocation2] sm:$0x1] %v13_v0 }
   0x3   :  { %v319_v1 = vld [vmem:[%s479_s1 + $0x38] sm:$0xff]  ;;  %v321_v2 = vld [vmem:[%s479_s1 + $0x48] sm:$0xff]  ;;  %v318_v3 = vld [vmem:[%s479_s1 + $0x30] sm:$0xff] }
   0x4   :  { %132 = vmatpush.bf16.msra.mxu0 %v319_v1  ;;  %152 = vmatpush.bf16.msra.mxu1 %v321_v2  ;;  %v320_v4 = vld [vmem:[%s479_s1 + $0x40] sm:$0xff]  ;;  %v263_v6 = vld [vmem:[%s478_s0 + $0x8] sm:$0xf0] }
   0x5   :  { %v310_v5 = vld [vmem:[%s478_s0 + $0x4] sm:$0xf]  ;;  %v317_v7 = vld [vmem:[%s479_s1 + $0x28] sm:$0xff] }
   0x6   :  { %v266_v8 = vor.u32 %v310_v5, %v263_v6 }
   0x8   :  { %133 = vmatpush.bf16.msra.mxu0 %v318_v3 }
   0x9   :  { %15 = vsyncpa [#allocation4], 0  ;;  %153 = vmatpush.bf16.msra.mxu1 %v320_v4  ;;  %vm128_vm0 = vcmask 261120   ;;  %v316_v9 = vld [vmem:[%s479_s1 + $0x20] sm:$0xff]  ;;  %v315_v10 = vld [vmem:[%s479_s1 + $0x18] sm:$0xff]  ;;  %vm163_vm1 = vcmask 130048  }
   0xa   :  { %v314_v11 = vld [vmem:[%s479_s1 + $0x10] sm:$0xff]  ;;  %v313_v12 = vld [vmem:[%s479_s1 + $0x8] sm:$0xff]  ;;  %v312_v13 = vld [vmem:[%s479_s1] sm:$0xff]  ;;  %vm224_vm2 = vcmask 254976   ;;  %v357_v41 = vmov 0   ;;  %s250_s24 = sshll.u32 %s486_s8, 4  ;;  %s251_s24 = int_to_ptr.hbm [resolvable:$true] %s250_s24 }
   0xb   :  { %v261_v14 = vld [vmem:[%s478_s0] sm:$0xf]  ;;  %v311_v15 = vld [vmem:[%s478_s0 + $0x4] sm:$0xf0]  ;;  %v190_v17 = vld [vmem:[%s482_s4 + $0x18] sm:$0xff]  ;;  %324 = vset.pattern.permute.xlu0 %v357_v41 }
   0xc   :  { %134 = vmatpush.bf16.msra.mxu0 %v317_v7  ;;  %307 = vmatmul.msk.bf16.vlgmr.msra.gmra.mxu1 %vm128_vm0, %v266_v8  ;;  %v262_v16 = vor.u32 %v311_v15, %v261_v14  ;;  %v189_v18 = vld [vmem:[%s482_s4 + $0x10] sm:$0xff]  ;;  %v188_v19 = vld [vmem:[%s482_s4 + $0x8] sm:$0xff]  ;;  %v325_v22 = vld [vmem:[%s480_s2] ss:$0 sm:$0xff] }
   0xd   :  { %210 = vmatpush.msra.mxu3 %v190_v17  ;;  %v162_v31 = vld [vmem:[%s481_s3] sm:$0x3]  ;;  %s358_s3 = smov [#allocation3]  }
   0xe   :  { %v187_v32 = vld [vmem:[%s482_s4] sm:$0xff]  ;;  %s248_s4 = sshll.u32 %s358_s3, 4  ;;  %s249_s4 = int_to_ptr.vmem [resolvable:$true] %s248_s4 }
   0xf   :  { %211 = vmatpush.msra.mxu3 %v189_v18  ;;  %v326_v34 = vld [vmem:[%s483_s5] ss:$0 sm:$0xff] }
  0x10   :  { %135 = vmatpush.bf16.msra.mxu0 %v316_v9  ;;  %v327_v37 = vld [vmem:[%s484_s6] ss:$0 sm:$0xff] }
  0x11   :  { %212 = vmatpush.msra.mxu3 %v188_v19  ;;  %v328_v42 = vld [vmem:[#allocation2] ss:$0 sm:$0xff] }
  0x13   :  { %213 = vmatpush.msra.mxu3 %v187_v32 }
  0x14   :  { %136 = vmatpush.bf16.msra.mxu0 %v315_v10 }
  0x18   :  { %137 = vmatpush.bf16.msra.mxu0 %v314_v11 }
  0x1c   :  { %138 = vmatpush.bf16.msra.mxu0 %v313_v12 }
  0x20   :  { %139 = vmatpush.bf16.msra.mxu0 %v312_v13 }
  0x23   :  { %140 = vmatmul.bf16.vlgmr.msra.gmra.mxu0 %v262_v16 }
  0x89   :  { %v155_v20 = vpop.f32.mrf.mxu1 }
  0x91   :  { %v157_v26 = vpop.f32.mrf.mxu1 }
  0xa0   :  { %v141_v21 = vpop.f32.mrf.mxu0 }
  0xa1   :  { %v142_v23 = vadd.f32 %v325_v22, %v141_v21 }
  0xa3   :  { %v156_v28 = vadd.f32 %v155_v20, %v142_v23 }
  0xa5   :  { %v160_v30 = vmax.f32 %v156_v28, 0.0 }
  0xa8   :  { %v143_v24 = vpop.f32.mrf.mxu0 }
  0xa9   :  { %v144_v25 = vadd.f32 %v325_v22, %v143_v24 }
  0xab   :  { %v158_v27 = vadd.f32 %v157_v26, %v144_v25 }
  0xad   :  { %v161_v29 = vmax.f32 %v158_v27, 0.0 }
  0xaf   :  { %181 = vmatpush.msra.mxu2 %v161_v29 }
  0xb1   :  { %182 = vmatpush.msra.mxu2 %v160_v30 }
  0xb2   :  { %308 = vmatmul.msk.f32.vlgmr.msra.gmra.mxu2 %vm163_vm1, %v162_v31 }
 0x135   :  { %v184_v33 = vpop.f32.mrf.mxu2 }
 0x136   :  { %309 = vmatmul.msk.f32.vlgmr.msra.gmra.mxu3 %vm128_vm0, %v184_v33 }
 0x1b9   :  { %v215_v35 = vpop.f32.mrf.mxu3 }
 0x1ba   :  { %v216_v36 = vadd.f32 %v326_v34, %v215_v35 }
 0x1bc   :  { %v218_v38 = vmax.f32 %v216_v36, 0.0 }
 0x1be   :  { %v223_v39 = vmul.f32 %v327_v37, %v218_v38 }
 0x1c0   :  { %v225_v40 = vsel %vm224_vm2, %v223_v39, 0.0 }
 0x1c1   :  { %226 = vadd.xlane.f32.xlu0 %v225_v40 }
 0x234   :  { %v227_v43 = vpop.xlane.xlu0 %226 }
 0x235   :  { %v232_v44 = vadd.f32 %v328_v42, %v227_v43 }
 0x237   :  { %v233_v45 = vmul.f32 0.5, %v232_v44 }
 0x239   :  { %329 = vtanh.f32 %v233_v45 }
 0x23f   :  { %v330_v46 = vpop.eup %329 }
 0x240   :  { %v235_v47 = vadd.f32 1.0, %v330_v46 }
 0x242   :  { %v236_v48 = vmul.f32 0.5, %v235_v47 }
 0x244   :  { %239 = vperm.xlu0 %324, %v236_v48  }
 0x2b6   :  { %v240_v49 = vpop.permute.xlu0 %239 }
 0x2b7   :  { %242 = vst [vmem:[#allocation3] sm:$0x3] %v240_v49 }
 0x2b8   :  { %253 = dma.vmem_to_hbm [thread:$0]  %s249_s4, 32, %s251_s24, [#allocation4]  }
 0x2b9   :  { %355 = dma.done.wait [#allocation4], 32  }
 0x2ba   :  { %356 = vsyncadd [#allocation4], 4294967264 }
 0x2bb   :  { %258 = vsyncpa [#allocation4], 1 }

</bundles_post_ra>
